<compile_context>
chip_gen: v5e
topology: v5e:2x2
jax: 0.10.0
libtpu: 0.0.40
codegen_flags: <defaults>
</compile_context>

<pallas_src>
import functools

import jax
import jax.numpy as jnp
from jax.experimental import pallas as pl
from jax.experimental.pallas import tpu as pltpu

HIDDEN = 50          # matches nn.Linear(num_states, 50)
LANE = 128           # TPU lane width


def _round_up(n, m):
    return ((n + m - 1) // m) * m


def _net_kernel(x_ref, w1_ref, b1_ref, w2_ref, b2_ref, out_ref, *, num_actions):
    # x: (tb, S) f32 -> bf16 for the MXU-native bf16 path.
    x = x_ref[...].astype(jnp.bfloat16)
    # fc1: (tb, S) @ (S, Hp) -> (tb, Hp), f32 accumulation.
    h = jnp.dot(x, w1_ref[...], preferred_element_type=jnp.float32)
    h = jnp.maximum(h + b1_ref[...], 0.0)                 # bias + ReLU in f32
    # out: (tb, Hp) @ (Hp, Ap) -> (tb, Ap), f32 accumulation.
    o = jnp.dot(h.astype(jnp.bfloat16), w2_ref[...],
                preferred_element_type=jnp.float32)
    o = o + b2_ref[...]
    # Store only the real action lanes (unpadded output block).
    out_ref[...] = o[:, :num_actions].astype(out_ref.dtype)


def prepare_params(w1, b1, w2, b2):
    """One-time parameter preparation (call once, outside the training loop).

    Pads the hidden/action dims up to the 128-lane width, transposes the
    PyTorch (out, in) weights to MXU-friendly (in, out) layout, and stores
    weights in bf16 (biases stay f32, added post-accumulation). Zero padding
    leaves the true outputs unchanged.
    """
    h, s = w1.shape
    a = w2.shape[0]
    hp = _round_up(h, LANE)
    ap = _round_up(a, LANE)
    w1p = jnp.zeros((s, hp), jnp.bfloat16).at[:, :h].set(
        w1.T.astype(jnp.bfloat16))
    b1p = jnp.zeros((1, hp), jnp.float32).at[0, :h].set(b1.astype(jnp.float32))
    w2p = jnp.zeros((hp, ap), jnp.bfloat16).at[:h, :a].set(
        w2.T.astype(jnp.bfloat16))
    b2p = jnp.zeros((1, ap), jnp.float32).at[0, :a].set(b2.astype(jnp.float32))
    return {"w1": w1p, "b1": b1p, "w2": w2p, "b2": b2p, "num_actions": a}


def net_forward(x, params, *, block_b=2048):
    """Forward pass of Net.

    Args:
      x: (B, num_states) float32
      params: dict from prepare_params()
    Returns:
      (B, num_actions) float32 action values.
    """
    w1p, b1p, w2p, b2p = params["w1"], params["b1"], params["w2"], params["b2"]
    num_actions = params["num_actions"]

    B, S = x.shape
    Hp = w1p.shape[1]
    Ap = w2p.shape[1]

    block_b = _round_up(max(block_b, 8), 8)
    if B <= 8:
        # Single tile; block shape equals the full array so no 8-row rule.
        tb = B
    else:
        # >=2 tiles when possible (v7x two TensorCores); rows multiple of 8.
        tb = min(block_b, _round_up(pl.cdiv(B, 2), 8))
    grid = (pl.cdiv(B, tb),)

    flops = 2 * B * (S * Hp + Hp * Ap)
    bytes_accessed = (4 * B * S                      # x (f32)
                      + 2 * (S * Hp + Hp * Ap)       # weights (bf16)
                      + 4 * (Hp + Ap)                # biases (f32)
                      + 4 * B * num_actions)         # output (f32, unpadded)

    kernel = functools.partial(_net_kernel, num_actions=num_actions)

    out = pl.pallas_call(
        kernel,
        out_shape=jax.ShapeDtypeStruct((B, num_actions), jnp.float32),
        grid=grid,
        in_specs=[
            pl.BlockSpec((tb, S), lambda i: (i, 0)),    # x: tiled over batch
            pl.BlockSpec((S, Hp), lambda i: (0, 0)),    # W1 (in, out): resident
            pl.BlockSpec((1, Hp), lambda i: (0, 0)),    # b1
            pl.BlockSpec((Hp, Ap), lambda i: (0, 0)),   # W2 (in, out): resident
            pl.BlockSpec((1, Ap), lambda i: (0, 0)),    # b2
        ],
        out_specs=pl.BlockSpec((tb, num_actions), lambda i: (i, 0)),
        compiler_params=pltpu.CompilerParams(
            dimension_semantics=("parallel",),
        ),
        cost_estimate=pl.CostEstimate(
            flops=flops, transcendentals=0, bytes_accessed=bytes_accessed),
    )(x, w1p, b1p, w2p, b2p)

    return out


def init_params(key, num_states, num_actions):
    """Deterministic init mirroring Net.__init__ (weights ~ N(0, 0.1)),
    kept in PyTorch (out, in) layout."""
    k1, k2, k3, k4 = jax.random.split(key, 4)
    w1 = 0.1 * jax.random.normal(k1, (HIDDEN, num_states), jnp.float32)
    b1 = 0.01 * jax.random.normal(k2, (HIDDEN,), jnp.float32)
    w2 = 0.1 * jax.random.normal(k3, (num_actions, HIDDEN), jnp.float32)
    b2 = 0.01 * jax.random.normal(k4, (num_actions,), jnp.float32)
    return w1, b1, w2, b2


if __name__ == "__main__":
    key = jax.random.PRNGKey(0)
    kx, kp = jax.random.split(key)

    batch = 2
    num_states = 16
    num_actions = 8

    x = jax.random.normal(kx, (batch, num_states), jnp.float32)
    w1, b1, w2, b2 = init_params(kp, num_states, num_actions)

    # One-time prep (pad + transpose + bf16) — not on the per-call hot path.
    params = prepare_params(w1, b1, w2, b2)

    actions_value = net_forward(x, params)
    jax.block_until_ready(actions_value)
    assert actions_value.shape == (batch, num_actions)

    # Reference matching the kernel's bf16-weight / f32-accumulate numerics.
    xb = x.astype(jnp.bfloat16).astype(jnp.float32)
    w1b = w1.astype(jnp.bfloat16).astype(jnp.float32)
    w2b = w2.astype(jnp.bfloat16).astype(jnp.float32)
    h_ref = jnp.maximum(xb @ w1b.T + b1, 0.0)
    ref_bf16 = h_ref.astype(jnp.bfloat16).astype(jnp.float32) @ w2b.T + b2
    assert jnp.allclose(actions_value, ref_bf16, atol=1e-2, rtol=1e-2)

    # Loose sanity check vs the true f32 PyTorch-equivalent forward.
    ref_f32 = jnp.maximum(x @ w1.T + b1, 0.0) @ w2.T + b2
    assert jnp.allclose(actions_value, ref_f32, atol=5e-2, rtol=5e-2)

    print("KERNEL_OK")
</pallas_src>

<mosaic_0001>
module attributes {stable_mosaic.version = 11 : i64} {
  func.func @_net_kernel(%arg0: i32, %arg1: memref<2x16xf32, #tpu.memory_space<vmem>>, %arg2: memref<16x128xbf16, #tpu.memory_space<vmem>>, %arg3: memref<1x128xf32, #tpu.memory_space<vmem>>, %arg4: memref<128x128xbf16, #tpu.memory_space<vmem>>, %arg5: memref<1x128xf32, #tpu.memory_space<vmem>>, %arg6: memref<2x8xf32, #tpu.memory_space<vmem>>) attributes {dimension_semantics = [#tpu.dimension_semantics<parallel>], iteration_bounds = array<i64: 1>, scalar_prefetch = 0 : i64, scratch_operands = 0 : i64, tpu.core_type = #tpu.core_type<tc>, window_params = [{transform_indices = @transform_0, window_bounds = array<i64: 2, 16>}, {pipeline_mode = #tpu.pipeline_mode<synchronous>, transform_indices = @transform_1, window_bounds = array<i64: 16, 128>}, {pipeline_mode = #tpu.pipeline_mode<synchronous>, transform_indices = @transform_2, window_bounds = array<i64: 1, 128>}, {pipeline_mode = #tpu.pipeline_mode<synchronous>, transform_indices = @transform_3, window_bounds = array<i64: 128, 128>}, {pipeline_mode = #tpu.pipeline_mode<synchronous>, transform_indices = @transform_4, window_bounds = array<i64: 1, 128>}, {transform_indices = @transform_5, window_bounds = array<i64: 2, 8>}]} {
    %c0 = arith.constant 0 : index
    %c0_0 = arith.constant 0 : index
    %0 = vector.load %arg1[%c0, %c0_0] : memref<2x16xf32, #tpu.memory_space<vmem>>, vector<2x16xf32>
    %1 = arith.truncf %0 : vector<2x16xf32> to vector<2x16xbf16>
    %c0_1 = arith.constant 0 : index
    %c0_2 = arith.constant 0 : index
    %2 = vector.load %arg2[%c0_1, %c0_2] : memref<16x128xbf16, #tpu.memory_space<vmem>>, vector<16x128xbf16>
    %cst = arith.constant dense<0.000000e+00> : vector<2x128xf32>
    %3 = tpu.matmul %1, %2, %cst {dimension_numbers = #tpu.dot_dimension_numbers<[1], [0], [0], [1], [0, 0, 1, 1], [], []>} : vector<2x16xbf16>, vector<16x128xbf16>, vector<2x128xf32> -> vector<2x128xf32>
    %c0_3 = arith.constant 0 : index
    %c0_4 = arith.constant 0 : index
    %4 = vector.load %arg3[%c0_3, %c0_4] : memref<1x128xf32, #tpu.memory_space<vmem>>, vector<1x128xf32>
    %5 = vector.broadcast %4 : vector<1x128xf32> to vector<2x128xf32>
    %6 = arith.addf %3, %5 : vector<2x128xf32>
    %cst_5 = arith.constant 0.000000e+00 : f32
    %7 = vector.broadcast %cst_5 : f32 to vector<2x128xf32>
    %8 = arith.maximumf %6, %7 : vector<2x128xf32>
    %9 = arith.truncf %8 : vector<2x128xf32> to vector<2x128xbf16>
    %c0_6 = arith.constant 0 : index
    %c0_7 = arith.constant 0 : index
    %10 = vector.load %arg4[%c0_6, %c0_7] : memref<128x128xbf16, #tpu.memory_space<vmem>>, vector<128x128xbf16>
    %cst_8 = arith.constant dense<0.000000e+00> : vector<2x128xf32>
    %11 = tpu.matmul %9, %10, %cst_8 {dimension_numbers = #tpu.dot_dimension_numbers<[1], [0], [0], [1], [0, 0, 1, 1], [], []>} : vector<2x128xbf16>, vector<128x128xbf16>, vector<2x128xf32> -> vector<2x128xf32>
    %c0_9 = arith.constant 0 : index
    %c0_10 = arith.constant 0 : index
    %12 = vector.load %arg5[%c0_9, %c0_10] : memref<1x128xf32, #tpu.memory_space<vmem>>, vector<1x128xf32>
    %13 = vector.broadcast %12 : vector<1x128xf32> to vector<2x128xf32>
    %14 = arith.addf %11, %13 : vector<2x128xf32>
    %15 = vector.extract_strided_slice %14 {offsets = [0, 0], sizes = [2, 8], strides = [1, 1]} : vector<2x128xf32> to vector<2x8xf32>
    %c0_11 = arith.constant 0 : index
    %c0_12 = arith.constant 0 : index
    %16 = vector.load %arg6[%c0_11, %c0_12] : memref<2x8xf32, #tpu.memory_space<vmem>>, vector<2x8xf32>
    tpu.vector_store %arg6[%c0_11, %c0_12], %15 {strides = array<i32>} : memref<2x8xf32, #tpu.memory_space<vmem>>, vector<2x8xf32>,
    return
  }
  func.func @transform_0(%arg0: i32) -> (i32, i32) {
    %c0_i32 = arith.constant 0 : i32
    %c0_i32_0 = arith.constant 0 : i32
    return %arg0, %c0_i32 : i32, i32
  }
  func.func @transform_1(%arg0: i32) -> (i32, i32) {
    %c0_i32 = arith.constant 0 : i32
    %c0_i32_0 = arith.constant 0 : i32
    %c0_i32_1 = arith.constant 0 : i32
    return %c0_i32, %c0_i32_0 : i32, i32
  }
  func.func @transform_2(%arg0: i32) -> (i32, i32) {
    %c0_i32 = arith.constant 0 : i32
    %c0_i32_0 = arith.constant 0 : i32
    %c0_i32_1 = arith.constant 0 : i32
    return %c0_i32, %c0_i32_0 : i32, i32
  }
  func.func @transform_3(%arg0: i32) -> (i32, i32) {
    %c0_i32 = arith.constant 0 : i32
    %c0_i32_0 = arith.constant 0 : i32
    %c0_i32_1 = arith.constant 0 : i32
    return %c0_i32, %c0_i32_0 : i32, i32
  }
  func.func @transform_4(%arg0: i32) -> (i32, i32) {
    %c0_i32 = arith.constant 0 : i32
    %c0_i32_0 = arith.constant 0 : i32
    %c0_i32_1 = arith.constant 0 : i32
    return %c0_i32, %c0_i32_0 : i32, i32
  }
  func.func @transform_5(%arg0: i32) -> (i32, i32) {
    %c0_i32 = arith.constant 0 : i32
    %c0_i32_0 = arith.constant 0 : i32
    return %arg0, %c0_i32 : i32, i32
  }
}

</mosaic_0001>

<bundles_post_ra>
// kernel: tpu_custom_call.1
= control target key start
LH: loop header
LB: loop body
LE: loop exit
PB: predicated region body
PF: predicated region fallthrough
CT: control target
= control target key end

     0   :  { %10 = vsyncpa [#allocation3], 0  ;;  %s411_s0 = inlined_call_operand.hbm [shape: f32[2,16], index: 0, kind: input, shape index: {}]   ;;  %s412_s1 = inlined_call_operand.hbm [shape: bf16[16,128], index: 1, kind: input, shape index: {}]   ;;  %s413_s2 = inlined_call_operand.vmem [shape: f32[1,128], index: 2, kind: input, shape index: {}]   ;;  %s414_s3 = inlined_call_operand.hbm [shape: bf16[128,128], index: 3, kind: input, shape index: {}]   ;;  %s415_s4 = inlined_call_operand.vmem [shape: f32[1,128], index: 4, kind: input, shape index: {}]   ;;  %s416_s5 = inlined_call_operand.hbm [shape: f32[2,8], index: 5, kind: output, shape index: {}]  }
   0x1   :  { %11 = vsyncpa [#allocation6], 0  ;;  %s28_s20 = sshll.u32 %s412_s1, 4  ;;  %s29_s20 = int_to_ptr.hbm [resolvable:$true] %s28_s20 }
   0x2   :  { %12 = vsyncpa [#allocation4], 0  ;;  %s357_s21 = smov [#allocation5]   ;;  %s18_s25 = sshll.u32 %s411_s0, 4  ;;  %s19_s25 = int_to_ptr.hbm [resolvable:$true] %s18_s25 }
   0x3   :  { %s30_s22 = sshll.u32 %s357_s21, 4  ;;  %s358_s26 = smov 64   ;;  %s31_s22 = int_to_ptr.vmem [resolvable:$true] %s30_s22 }
   0x4   :  { %s359_s27 = smov 4   ;;  %s360_s28 = smov [#allocation2]  }
   0x5   :  { %36 = dma.hbm_to_vmem [thread:$0]  %s29_s20, 128, %s31_s22, [#allocation6], %s358_s26, %s358_s26, %s359_s27  }
   0x6   :  { %s20_s29 = sshll.u32 %s360_s28, 4  ;;  %s43_s7 = sshll.u32 %s414_s3, 4  ;;  %s21_s29 = int_to_ptr.vmem [resolvable:$true] %s20_s29  ;;  %s44_s7 = int_to_ptr.hbm [resolvable:$true] %s43_s7 }
   0x7   :  { %23 = dma.hbm_to_vmem [thread:$0]  %s19_s25, 32, %s21_s29, [#allocation3]  }
   0x8   :  { %s361_s1 = smov [#allocation7]  }
   0x9   :  { %s45_s8 = sshll.u32 %s361_s1, 4  ;;  %s46_s8 = int_to_ptr.vmem [resolvable:$true] %s45_s8 }
   0xa   :  { %51 = dma.hbm_to_vmem [thread:$0]  %s44_s7, 1024, %s46_s8, [#allocation6], %s358_s26, %s358_s26, %s359_s27  }
   0xb   :  { %351 = dma.done.wait [#allocation3], 32  }
   0xc   :  { %352 = vsyncadd [#allocation3], 4294967264 }
   0xd   :  { %353 = dma.done.wait [#allocation6], 1152  }
   0xe   :  { %354 = vsyncadd [#allocation6], 4294966144  ;;  %v238_v0 = vld [vmem:[#allocation5] sm:$0xff]  ;;  %v67_v1 = vld [vmem:[#allocation2] sm:$0x3]  ;;  %vm81_vm0 = vcmask 130048  }
   0xf   :  { %v246_v2 = vld [vmem:[#allocation7 + $0x38] sm:$0xff]  ;;  %v68_v3 = vpack.c.bf16 %v67_v1, %v67_v1  ;;  %92 = vmatpush.bf16.msra.mxu0 %v238_v0  ;;  %v245_v4 = vld [vmem:[#allocation7 + $0x30] sm:$0xff]  ;;  %v244_v5 = vld [vmem:[#allocation7 + $0x28] sm:$0xff]  ;;  %s362_s11 = smov [#allocation8]   ;;  %s190_s15 = sshll.u32 %s416_s5, 4  ;;  %vm181_vm1 = vcmask 58368   ;;  %s191_s15 = int_to_ptr.hbm [resolvable:$true] %s190_s15 }
  0x10   :  { %168 = vmatpush.bf16.msra.mxu1 %v246_v2  ;;  %v243_v6 = vld [vmem:[#allocation7 + $0x20] sm:$0xff]  ;;  %v242_v7 = vld [vmem:[#allocation7 + $0x18] sm:$0xff]  ;;  %v241_v8 = vld [vmem:[#allocation7 + $0x10] sm:$0xff]  ;;  %s188_s12 = sshll.u32 %s362_s11, 4  ;;  %s189_s12 = int_to_ptr.vmem [resolvable:$true] %s188_s12 }
  0x11   :  { %v240_v9 = vld [vmem:[#allocation7 + $0x8] sm:$0xff]  ;;  %v239_v10 = vld [vmem:[#allocation7] sm:$0xff]  ;;  %v253_v11 = vld [vmem:[%s413_s2] ss:$0 sm:$0xff] }
  0x12   :  { %205 = vmatmul.msk.bf16.vlgmr.msra.gmra.mxu0 %vm81_vm0, %v68_v3  ;;  %v254_v17 = vld [vmem:[%s415_s4] ss:$0 sm:$0xff] }
  0x14   :  { %169 = vmatpush.bf16.msra.mxu1 %v245_v4 }
  0x18   :  { %170 = vmatpush.bf16.msra.mxu1 %v244_v5 }
  0x1c   :  { %171 = vmatpush.bf16.msra.mxu1 %v243_v6 }
  0x20   :  { %172 = vmatpush.bf16.msra.mxu1 %v242_v7 }
  0x24   :  { %173 = vmatpush.bf16.msra.mxu1 %v241_v8 }
  0x28   :  { %174 = vmatpush.bf16.msra.mxu1 %v240_v9 }
  0x2c   :  { %175 = vmatpush.bf16.msra.mxu1 %v239_v10 }
  0x8f   :  { %v94_v12 = vpop.f32.mrf.mxu0 }
  0x90   :  { %v95_v13 = vadd.f32 %v253_v11, %v94_v12 }
  0x92   :  { %v98_v14 = vmax.f32 %v95_v13, 0.0 }
  0x94   :  { %v99_v15 = vpack.c.bf16 %v98_v14, %v98_v14 }
  0x96   :  { %176 = vmatmul.bf16.vlgmr.msra.gmra.mxu1 %v99_v15 }
  0x97   :  { %v96_v16 = vpop.f32.mrf.mxu0 }
 0x113   :  { %v177_v18 = vpop.f32.mrf.mxu1 }
 0x114   :  { %v178_v19 = vadd.f32 %v254_v17, %v177_v18 }
 0x116   :  { %182 = vst.msk [vmem:[#allocation8] sm:$0x3] %vm181_vm1, %v178_v19 }
 0x117   :  { %193 = dma.vmem_to_hbm [thread:$0]  %s189_s12, 32, %s191_s15, [#allocation4]  }
 0x11b   :  { %v179_v20 = vpop.f32.mrf.mxu1 }
 0x11c   :  { %355 = dma.done.wait [#allocation4], 32  }
 0x11d   :  { %356 = vsyncadd [#allocation4], 4294967264 }
 0x11e   :  { %198 = vsyncpa [#allocation3], 1 }
 0x11f   :  { %199 = vsyncpa [#allocation6], 1 }
 0x120   :  { %200 = vsyncpa [#allocation4], 1 }

</bundles_post_ra>
